<compile_context>
chip_gen: v5e
topology: v5e:2x2
jax: 0.10.0
libtpu: 0.0.40
codegen_flags: <defaults>
</compile_context>

<pallas_src>
import math

import jax
import jax.numpy as jnp
import numpy as np
from jax.experimental import pallas as pl
from jax.experimental.pallas import tpu as pltpu


def _vmem_capacity_bytes():
    """Physical VMEM of the attached chip; conservative (v7x) default."""
    try:
        return int(pltpu.get_tpu_info().vmem_capacity_bytes)
    except Exception:
        return 64 << 20


def _pick_batch_block(n, c, l_out, itemsize, folded):
    """Batch elements per grid step from an honest per-step VMEM budget."""
    cap = _vmem_capacity_bytes()
    # ~40% of physical VMEM per step leaves headroom for compiler scratch:
    # ~25 MiB on v7x (64 MiB), capped at 48 MiB on v5e/v6e (128 MiB).
    budget = min(int(cap * 0.4), 48 << 20)

    in_bytes = (2 * l_out + 1) * c * itemsize          # xe + xo per batch elem
    out_bytes = l_out * c * itemsize                   # output per batch elem
    per_batch = 2 * (in_bytes + out_bytes)             # x2: double buffering
    fixed = 2 * (3 * c * c + c) * itemsize             # weights + bias buffers

    avail = max(budget - fixed, per_batch)
    nb = int(max(1, min(n, avail // per_batch)))

    # Keep >= 2 grid steps so the "parallel" axis can split across both v7x
    # TensorCores (harmless on single-TC v5e/v6e: nb only needs to amortize
    # the ~0.35us per-step overhead).
    if n >= 2:
        nb = min(nb, max(1, n // 2))

    if folded:
        # Bound the static unroll / slab width, and make the lane-folded
        # output slab (nb * l_out lanes) a multiple of 128 when possible.
        nb = min(nb, 256, max(1, 4096 // max(l_out, 1)))
        lane_q = 128 // math.gcd(l_out, 128)
        if nb >= lane_q:
            nb = (nb // lane_q) * lane_q
    return max(1, nb)


def _make_kernel(nb, l_out, folded):
    """Conv1d(dim, dim, k=3, stride=2, pad=1) over one block of NB batch elems.

    xe_ref: (NB, C, L_out + 1)  even columns of the zero-padded input
    xo_ref: (NB, C, L_out)      odd  columns of the zero-padded input
    w_ref : (3, C, C)           w_ref[k] = weight[:, :, k]
    b_ref : (C, 1)
    o_ref : (NB, C, L_out)            direct layout      (l_out >= 128)
            (1, C, NB*L_out)          lane-folded slab   (l_out <  128)
    """

    def kernel(xe_ref, xo_ref, w_ref, b_ref, o_ref):
        def compute(b):
            xe_b = xe_ref[b]                      # (C, L_out + 1)
            xo_b = xo_ref[b]                      # (C, L_out)
            # Three accumulated MXU dots — no im2col temporary.
            acc = jnp.dot(w_ref[0], xe_b[:, :l_out],        # tap k=0
                          preferred_element_type=jnp.float32)
            acc = acc + jnp.dot(w_ref[1], xo_b,             # tap k=1
                                preferred_element_type=jnp.float32)
            acc = acc + jnp.dot(w_ref[2], xe_b[:, 1:],      # tap k=2
                                preferred_element_type=jnp.float32)
            return acc + b_ref[...]               # bias in the epilogue

        if folded:
            # Static loop -> static lane offsets in the lane-dense slab store.
            for b in range(nb):
                o_ref[0, :, b * l_out:(b + 1) * l_out] = (
                    compute(b).astype(o_ref.dtype))
        else:
            if nb == 1:
                o_ref[0] = compute(0).astype(o_ref.dtype)
            else:
                def body(b, carry):
                    o_ref[b] = compute(b).astype(o_ref.dtype)
                    return carry
                jax.lax.fori_loop(0, nb, body, 0, unroll=min(nb, 4))

    return kernel


def downsample1d(x, weight, bias):
    """x: (N, C, L) f32; weight: (C, C, 3); bias: (C,). Returns (N, C, L_out)."""
    n, c, l = x.shape
    l_out = (l + 2 * 1 - 3) // 2 + 1

    # --- JAX glue (fused by XLA): pad once, deinterleave even/odd once. ---
    x_pad = jnp.pad(x, ((0, 0), (0, 0), (1, 1)))
    xe = x_pad[:, :, 0::2][:, :, : l_out + 1]      # (N, C, L_out + 1)
    xo = x_pad[:, :, 1::2][:, :, : l_out]          # (N, C, L_out)

    w3 = jnp.transpose(weight, (2, 0, 1))          # (3, C, C), w3[k] = W[:,:,k]
    b2d = bias.reshape(c, 1)

    folded = l_out < 128
    nb = _pick_batch_block(n, c, l_out, x.dtype.itemsize, folded)
    n_blocks = pl.cdiv(n, nb)
    n_pad = n_blocks * nb
    if n_pad != n:
        # Pad the batch axis instead of shrinking NB to a divisor of N.
        xe = jnp.pad(xe, ((0, n_pad - n), (0, 0), (0, 0)))
        xo = jnp.pad(xo, ((0, n_pad - n), (0, 0), (0, 0)))

    cap = _vmem_capacity_bytes()
    vmem_limit = min(cap * 3 // 4, 96 << 20)

    kernel = _make_kernel(nb, l_out, folded)
    in_specs = [
        pl.BlockSpec((nb, c, l_out + 1), lambda i: (i, 0, 0)),
        pl.BlockSpec((nb, c, l_out), lambda i: (i, 0, 0)),
        # Constant index_maps: weights/bias stay resident across grid steps.
        pl.BlockSpec((3, c, c), lambda i: (0, 0, 0)),
        pl.BlockSpec((c, 1), lambda i: (0, 0)),
    ]
    compiler_params = pltpu.CompilerParams(
        dimension_semantics=("parallel",),
        vmem_limit_bytes=int(vmem_limit))

    if folded:
        # Lane-folded slab: batch folded into lanes, unfolded by a cheap
        # wrapper reshape/transpose (fallback only; l_out < 128).
        out = pl.pallas_call(
            kernel,
            out_shape=jax.ShapeDtypeStruct((n_blocks, c, nb * l_out), x.dtype),
            grid_spec=pltpu.PrefetchScalarGridSpec(
                num_scalar_prefetch=0,
                grid=(n_blocks,),
                in_specs=in_specs,
                out_specs=pl.BlockSpec((1, c, nb * l_out), lambda i: (i, 0, 0)),
            ),
            compiler_params=compiler_params,
        )(xe, xo, w3, b2d)
        out = out.reshape(n_blocks, c, nb, l_out)
        out = jnp.transpose(out, (0, 2, 1, 3)).reshape(n_pad, c, l_out)
    else:
        # Direct layout: already lane-dense, no wrapper transpose needed.
        out = pl.pallas_call(
            kernel,
            out_shape=jax.ShapeDtypeStruct((n_pad, c, l_out), x.dtype),
            grid_spec=pltpu.PrefetchScalarGridSpec(
                num_scalar_prefetch=0,
                grid=(n_blocks,),
                in_specs=in_specs,
                out_specs=pl.BlockSpec((nb, c, l_out), lambda i: (i, 0, 0)),
            ),
            compiler_params=compiler_params,
        )(xe, xo, w3, b2d)

    return out[:n] if n_pad != n else out


def _reference_conv(x, weight, bias):
    # lax conv with NCL layout, stride 2, padding 1 — PyTorch Conv1d semantics.
    out = jax.lax.conv_general_dilated(
        x, weight,
        window_strides=(2,),
        padding=((1, 1),),
        dimension_numbers=("NCH", "OIH", "NCH"),
    )
    return out + bias.reshape(1, -1, 1)


def _run_case(key, batch, dim, length):
    kx, kw, kb = jax.random.split(key, 3)
    x = jax.random.normal(kx, (batch, dim, length), dtype=jnp.float32)
    # PyTorch Conv1d default init: uniform(-1/sqrt(fan_in), 1/sqrt(fan_in)).
    fan_in = dim * 3
    bound = 1.0 / np.sqrt(fan_in)
    weight = jax.random.uniform(kw, (dim, dim, 3), jnp.float32, -bound, bound)
    bias = jax.random.uniform(kb, (dim,), jnp.float32, -bound, bound)

    out = jax.block_until_ready(downsample1d(x, weight, bias))
    ref = _reference_conv(x, weight, bias)
    l_out = (length + 2 - 3) // 2 + 1
    assert out.shape == (batch, dim, l_out), out.shape
    np.testing.assert_allclose(np.asarray(out), np.asarray(ref),
                               rtol=1e-5, atol=1e-5)


if __name__ == "__main__":
    key = jax.random.PRNGKey(0)
    k1, k2 = jax.random.split(key, 2)

    # Small shape consistent with Downsample1d(dim=4) — exercises the
    # lane-folded fallback path (L_out = 8 < 128).
    _run_case(k1, batch=2, dim=4, length=16)

    # Slightly longer sequence — exercises the direct (no-transpose) path
    # (L_out = 128) and the fori_loop batch loop (NB = 2).
    _run_case(k2, batch=4, dim=8, length=256)

    print("KERNEL_OK")
</pallas_src>

<mosaic_0001>
module attributes {stable_mosaic.version = 11 : i64} {
  func.func @kernel(%arg0: i32, %arg1: memref<1x4x9xf32, #tpu.memory_space<vmem>>, %arg2: memref<1x4x8xf32, #tpu.memory_space<vmem>>, %arg3: memref<3x4x4xf32, #tpu.memory_space<vmem>>, %arg4: memref<4x1xf32, #tpu.memory_space<vmem>>, %arg5: memref<1x4x8xf32, #tpu.memory_space<vmem>>) attributes {dimension_semantics = [#tpu.dimension_semantics<parallel>], iteration_bounds = array<i64: 2>, scalar_prefetch = 0 : i64, scratch_operands = 0 : i64, tpu.core_type = #tpu.core_type<tc>, window_params = [{transform_indices = @transform_0, window_bounds = array<i64: 1, 4, 9>}, {transform_indices = @transform_1, window_bounds = array<i64: 1, 4, 8>}, {pipeline_mode = #tpu.pipeline_mode<synchronous>, transform_indices = @transform_2, window_bounds = array<i64: 3, 4, 4>}, {pipeline_mode = #tpu.pipeline_mode<synchronous>, transform_indices = @transform_3, window_bounds = array<i64: 4, 1>}, {transform_indices = @transform_4, window_bounds = array<i64: 1, 4, 8>}]} {
    %c0 = arith.constant 0 : index
    %c0_0 = arith.constant 0 : index
    %c0_1 = arith.constant 0 : index
    %0 = vector.load %arg1[%c0, %c0_0, %c0_1] : memref<1x4x9xf32, #tpu.memory_space<vmem>>, vector<1x4x9xf32>
    %1 = vector.shape_cast %0 : vector<1x4x9xf32> to vector<4x9xf32>
    %c0_2 = arith.constant 0 : index
    %c0_3 = arith.constant 0 : index
    %c0_4 = arith.constant 0 : index
    %2 = vector.load %arg2[%c0_2, %c0_3, %c0_4] : memref<1x4x8xf32, #tpu.memory_space<vmem>>, vector<1x4x8xf32>
    %3 = vector.shape_cast %2 : vector<1x4x8xf32> to vector<4x8xf32>
    %c0_5 = arith.constant 0 : index
    %c0_6 = arith.constant 0 : index
    %c0_7 = arith.constant 0 : index
    %4 = vector.load %arg3[%c0_5, %c0_6, %c0_7] : memref<3x4x4xf32, #tpu.memory_space<vmem>>, vector<1x4x4xf32>
    %5 = vector.shape_cast %4 : vector<1x4x4xf32> to vector<4x4xf32>
    %6 = vector.extract_strided_slice %1 {offsets = [0, 0], sizes = [4, 8], strides = [1, 1]} : vector<4x9xf32> to vector<4x8xf32>
    %cst = arith.constant dense<0.000000e+00> : vector<4x8xf32>
    %7 = tpu.matmul %5, %6, %cst {dimension_numbers = #tpu.dot_dimension_numbers<[1], [0], [0], [1], [0, 0, 1, 1], [], []>} : vector<4x4xf32>, vector<4x8xf32>, vector<4x8xf32> -> vector<4x8xf32>
    %c1 = arith.constant 1 : index
    %c0_8 = arith.constant 0 : index
    %c0_9 = arith.constant 0 : index
    %8 = vector.load %arg3[%c1, %c0_8, %c0_9] : memref<3x4x4xf32, #tpu.memory_space<vmem>>, vector<1x4x4xf32>
    %9 = vector.shape_cast %8 : vector<1x4x4xf32> to vector<4x4xf32>
    %cst_10 = arith.constant dense<0.000000e+00> : vector<4x8xf32>
    %10 = tpu.matmul %9, %3, %cst_10 {dimension_numbers = #tpu.dot_dimension_numbers<[1], [0], [0], [1], [0, 0, 1, 1], [], []>} : vector<4x4xf32>, vector<4x8xf32>, vector<4x8xf32> -> vector<4x8xf32>
    %11 = arith.addf %7, %10 : vector<4x8xf32>
    %c2 = arith.constant 2 : index
    %c0_11 = arith.constant 0 : index
    %c0_12 = arith.constant 0 : index
    %12 = vector.load %arg3[%c2, %c0_11, %c0_12] : memref<3x4x4xf32, #tpu.memory_space<vmem>>, vector<1x4x4xf32>
    %13 = vector.shape_cast %12 : vector<1x4x4xf32> to vector<4x4xf32>
    %14 = vector.extract_strided_slice %1 {offsets = [0, 1], sizes = [4, 8], strides = [1, 1]} : vector<4x9xf32> to vector<4x8xf32>
    %cst_13 = arith.constant dense<0.000000e+00> : vector<4x8xf32>
    %15 = tpu.matmul %13, %14, %cst_13 {dimension_numbers = #tpu.dot_dimension_numbers<[1], [0], [0], [1], [0, 0, 1, 1], [], []>} : vector<4x4xf32>, vector<4x8xf32>, vector<4x8xf32> -> vector<4x8xf32>
    %16 = arith.addf %11, %15 : vector<4x8xf32>
    %c0_14 = arith.constant 0 : index
    %c0_15 = arith.constant 0 : index
    %17 = vector.load %arg4[%c0_14, %c0_15] : memref<4x1xf32, #tpu.memory_space<vmem>>, vector<4x1xf32>
    %18 = vector.broadcast %17 : vector<4x1xf32> to vector<4x8xf32>
    %19 = arith.addf %16, %18 : vector<4x8xf32>
    %c0_16 = arith.constant 0 : index
    %c0_17 = arith.constant 0 : index
    %c0_18 = arith.constant 0 : index
    %20 = vector.load %arg5[%c0_16, %c0_17, %c0_18] : memref<1x4x8xf32, #tpu.memory_space<vmem>>, vector<1x4x8xf32>
    %21 = vector.shape_cast %20 : vector<1x4x8xf32> to vector<4x8xf32>
    %22 = vector.shape_cast %19 : vector<4x8xf32> to vector<1x4x8xf32>
    tpu.vector_store %arg5[%c0_16, %c0_17, %c0_18], %22 {strides = array<i32>} : memref<1x4x8xf32, #tpu.memory_space<vmem>>, vector<1x4x8xf32>,
    return
  }
  func.func @transform_0(%arg0: i32) -> (i32, i32, i32) {
    %c0_i32 = arith.constant 0 : i32
    %c0_i32_0 = arith.constant 0 : i32
    %c0_i32_1 = arith.constant 0 : i32
    return %arg0, %c0_i32, %c0_i32_0 : i32, i32, i32
  }
  func.func @transform_1(%arg0: i32) -> (i32, i32, i32) {
    %c0_i32 = arith.constant 0 : i32
    %c0_i32_0 = arith.constant 0 : i32
    %c0_i32_1 = arith.constant 0 : i32
    return %arg0, %c0_i32, %c0_i32_0 : i32, i32, i32
  }
  func.func @transform_2(%arg0: i32) -> (i32, i32, i32) {
    %c0_i32 = arith.constant 0 : i32
    %c0_i32_0 = arith.constant 0 : i32
    %c0_i32_1 = arith.constant 0 : i32
    %c0_i32_2 = arith.constant 0 : i32
    return %c0_i32, %c0_i32_0, %c0_i32_1 : i32, i32, i32
  }
  func.func @transform_3(%arg0: i32) -> (i32, i32) {
    %c0_i32 = arith.constant 0 : i32
    %c0_i32_0 = arith.constant 0 : i32
    %c0_i32_1 = arith.constant 0 : i32
    return %c0_i32, %c0_i32_0 : i32, i32
  }
  func.func @transform_4(%arg0: i32) -> (i32, i32, i32) {
    %c0_i32 = arith.constant 0 : i32
    %c0_i32_0 = arith.constant 0 : i32
    %c0_i32_1 = arith.constant 0 : i32
    return %arg0, %c0_i32, %c0_i32_0 : i32, i32, i32
  }
}

</mosaic_0001>

<bundles_post_ra>
// kernel: tpu_custom_call.1
= control target key start
LH: loop header
LB: loop body
LE: loop exit
PB: predicated region body
PF: predicated region fallthrough
CT: control target
= control target key end

     0   :  { %s945_s0 = inlined_call_operand.hbm [shape: f32[2,4,9], index: 0, kind: input, shape index: {}]   ;;  %s946_s1 = inlined_call_operand.hbm [shape: f32[2,4,8], index: 1, kind: input, shape index: {}]   ;;  %s947_s2 = inlined_call_operand.hbm [shape: f32[3,4,4], index: 2, kind: input, shape index: {}]   ;;  %s948_s3 = inlined_call_operand.vmem [shape: f32[4,1], index: 3, kind: input, shape index: {}]   ;;  %s949_s4 = inlined_call_operand.hbm [shape: f32[2,4,8], index: 4, kind: output, shape index: {}]  }
   0x1   :  { %951 = sst [smem:[#allocation15_spill]] %s947_s2 }
   0x2   :  { %9 = vsyncpa [#allocation3], 0 }
   0x3   :  { %11 = vsyncpa [#allocation3 + $0x1], 0 }
   0x4   :  { %12 = vsyncpa [#allocation6], 0 }
   0x5   :  { %14 = vsyncpa [#allocation6 + $0x1], 0 }
   0x6   :  { %15 = vsyncpa [#allocation4], 0 }
   0x7   :  { %17 = vsyncpa [#allocation4 + $0x1], 0  ;;  %s772_s15 = smov 0   ;;  %s774_s16 = smov 0  }
   0x8   :  { %s776_s17 = smov 0   ;;  %s778_s18 = smov 0  }
   0x9 LB: > { %952 = sst [smem:[#allocation13_spill]] %s736_s17  ;;  %s796_s22 = sadd.s32 4294967295, %s740_s18   ;;  %s740_s18 = sphi %s778_s18, %s966_s18   ;;  %s736_s17 = sphi %s776_s17, %s963_s17   ;;  %s732_s16 = sphi %s774_s16, %s965_s16   ;;  %s728_s15 = sphi %s772_s15, %s964_s15  }
   0xa   : > { %s953_s2 = sld [smem:[#allocation15_spill]]  ;;  %p487_p0 = scmp.ge.s32.totalorder %s740_s18, 1 }
   0xb   : > { %p44_p1 = scmp.eq.s32.totalorder %s796_s22, 0  ;;  %p148_p2 = scmp.lt.s32.totalorder %s740_s18, 3 }
   0xc   : > { %s742_s24 = smov [#allocation7]   ;;  %s743_s26 = smov 64  }
   0xd   : > { %p801_p3 = pnand %p487_p0, %p148_p2  ;;  %s161_s25 = sshll.u32 %s742_s24, 4  ;;  %s162_s25 = int_to_ptr.vmem [resolvable:$true] %s161_s25 }
   0xe   : > { %s744_s27 = smov 4   ;;  %s486_s28 = sadd.s32 4294967294, %s740_s18  }
   0xf   : > { %p519_p4 = pneg %p801_p3  ;;  %s812_s29 = sadd.s32 1, %s740_s18  }
  0x10   : > { %s159_s21 = sshll.u32 %s953_s2, 4  ;;  %s30_s30 = sadd.s32 1, %s736_s17  ;;  %s160_s21 = int_to_ptr.hbm [resolvable:$true] %s159_s21 }
  0x11   : > { %p520_p6 = pnand %p519_p4, %p44_p1  ;;  %s27_s5 = ssub.s32 %s740_s18, %s812_s29 }
  0x12   : > { %p37_p7 = scmp.ne.s32.totalorder %s736_s17, %s732_s16  ;;  %p28_p8 = scmp.eq.s32.totalorder %s27_s5, 0 }
  0x13   : > { %522 = dma.hbm_to_vmem [thread:$0]  (!%p520_p6), %s160_s21, 192, %s162_s25, [#allocation6], %s743_s26, %s743_s26, %s744_s27  }
  0x14   : > { %p38_p9 = scmp.eq.s32.totalorder %s740_s18, 0  ;;  %p43_p10 = scmp.ne.s32.totalorder %s732_s16, %s728_s15 }
  0x15   : > { %p135_p11 = scmp.eq.s32.totalorder %s796_s22, 1  ;;  %p141_p2 = scmp.eq.s32.totalorder %s486_s28, 1 }
  0x16   : > { %s824_s6 = scalar_select %p28_p8, %s736_s17, %s30_s30  }
  0x17   : > { %p826_p12 = por %p38_p9, %p37_p7  ;;  %p832_p13 = por %p44_p1, %p43_p10 }
  0x18   : > { %955 = sst [smem:[#allocation14_spill]] %s824_s6  ;;  %p836_p0 = por %p135_p11, %p37_p7 }
  0x19   : > { %p535_p4 = scmp.lt.s32.totalorder %s740_s18, 2  ;;  %s178_s10 = sand.u32 1, %s736_s17  }
  0x1a   : > { %p842_p6 = por %p141_p2, %p43_p10  ;;  %s490_s12 = sshll.u32 %s178_s10, 2 }
  0x1b   : > { %s491_s13 = sshll.u32 %s740_s18, 2  ;;  %s182_s24 = scalar_lea.vmem [#allocation2], %s490_s12 }
  0x1c   : > { %s186_s20 = scalar_lea.hbm %s945_s0, %s491_s13  ;;  %s190_s25 = sshll.u32 %s182_s24, 4  ;;  %s191_s25 = int_to_ptr.vmem [resolvable:$true] %s190_s25 }
  0x1d   : > { %s188_s21 = sshll.u32 %s186_s20, 4  ;;  %p852_p7 = pnand %p535_p4, %p826_p12  ;;  %s189_s21 = int_to_ptr.hbm [resolvable:$true] %s188_s21 }
  0x1e   : > { %s205_s30 = scalar_lea.hbm %s946_s1, %s491_s13  ;;  %s197_s5 = sand.u32 1, %s740_s18  }
  0x1f   : > { %s179_s2 = scalar_lea.sflag [#allocation3], %s178_s10  ;;  %s606_s14 = sshra.s32 %s189_s21, 4  ;;  %s607_s14 = int_to_ptr.hbm [resolvable:$true] %s606_s14 }
  0x20   : > { %s608_s19 = scalar_lea.hbm %s607_s14, 4  ;;  %p610_p9 = pneg %p852_p7 }
  0x21   : > { %p609_p8 = scmp.ne.s32.totalorder %s607_s14, %s608_s19  ;;  %s613_s24 = scalar_lea.hbm %s945_s0, 8 }
  0x22   : > { %p614_p12 = scmp.lt.s32.totalorder %s607_s14, %s945_s0  ;;  %p615_p2 = scmp.lt.s32.totalorder %s613_s24, %s608_s19 }
  0x23   : > { %p611_p10 = pnand %p610_p9, %p609_p8 }
  0x24   : > { %p616_p4 = por %p615_p2, %p614_p12 }
  0x25   : > { %p612_p11 = pneg %p611_p10 }
  0x27   : > { %p617_p5 = pnand %p616_p4, %p612_p11 }
  0x29   : > { %620 = shalt.err (!%p617_p5)
}
  0x2a   : > { %526 = dma.hbm_to_vmem [thread:$0]  (!%p852_p7), %s189_s21, 64, %s191_s25, %s179_s2  }
  0x2b   : > { %s207_s10 = sshll.u32 %s205_s30, 4  ;;  %s201_s13 = scalar_lea.vmem [#allocation5], %s490_s12  ;;  %s208_s10 = int_to_ptr.hbm [resolvable:$true] %s207_s10 }
  0x2c   : > { %s209_s6 = sshll.u32 %s201_s13, 4  ;;  %s198_s17 = scalar_lea.sflag [#allocation6], %s197_s5  ;;  %s210_s6 = int_to_ptr.vmem [resolvable:$true] %s209_s6 }
  0x2d   : > { %s636_s7 = sshra.s32 %s208_s10, 4  ;;  %s643_s24 = scalar_lea.hbm %s946_s1, 8  ;;  %s637_s7 = int_to_ptr.hbm [resolvable:$true] %s636_s7 }
  0x2e   : > { %s638_s20 = scalar_lea.hbm %s637_s7, 4  ;;  %p644_p5 = scmp.lt.s32.totalorder %s637_s7, %s946_s1 }
  0x2f   : > { %p639_p8 = scmp.ne.s32.totalorder %s637_s7, %s638_s20  ;;  %p645_p11 = scmp.lt.s32.totalorder %s643_s24, %s638_s20 }
  0x31   : > { %p641_p10 = pnand %p639_p8, %p610_p9  ;;  %p646_p2 = por %p645_p11, %p644_p5 }
  0x33   : > { %p642_p12 = pneg %p641_p10 }
  0x35   : > { %p647_p4 = pnand %p646_p2, %p642_p12 }
  0x37   : > { %650 = shalt.err (!%p647_p4)
}
  0x38   : > { %529 = dma.hbm_to_vmem [thread:$0]  (!%p852_p7), %s208_s10, 64, %s210_s6, %s198_s17  }
  0x39   : > { %218 = sbr.rel (%p801_p3) target bundleno = 324 (0x144), region = 36  ;;  %s887_s12 = sand.u32 (!%p801_p3), 1, %s732_s16  }
  0x3a   : > { %s890_s21 = sshll.u32 (!%p801_p3), %s887_s12, 2  ;;  %s221_s25 = scalar_lea.sflag (!%p801_p3), [#allocation3], %s887_s12 }
  0x3b   : > { %s224_s30 = scalar_lea.vmem (!%p801_p3), [#allocation2], %s890_s21 }
  0x3e   : > { %711 = dma.done.wait (%p832_p13), %s221_s25, 64  }
  0x3f   : > { %713 = vsyncadd (%p832_p13), %s221_s25, 4294967232  ;;  %s230_s17 = sand.u32 1, %s796_s22   ;;  %s234_s6 = scalar_lea.vmem [#allocation5], %s890_s21 }
  0x40   : > { %s231_s23 = scalar_lea.sflag [#allocation6], %s230_s17 }
  0x41   : > { %715 = dma.done.wait (%p832_p13), %s231_s23, 64  }
  0x42   : > { %717 = vsyncadd (%p832_p13), %s231_s23, 4294967232 }
  0x43   : > { %719 = dma.done.wait (%p44_p1), [#allocation6], 192  }
  0x44   : > { %721 = vsyncadd (%p44_p1), [#allocation6], 4294967104  ;;  %v270_v0 = vld [vmem:[%s224_s30] sm:$0xf]  ;;  %s745_s26 = smov 127   ;;  %vm279_vm0 = vcmask 1043456  }
  0x45   : > { %331 = vrot.lane.b32.xlu0 %v270_v0, %s745_s26  ;;  %vm275_vm1 = vcmask 31744   ;;  %501 = vmatpush.msk.msra.mxu1 %vm279_vm0, %v270_v0  ;;  %v271_v1 = vld [vmem:[%s234_s6] sm:$0xf]  ;;  %v274_v2 = vld [vmem:[#allocation7 + $0x4] sm:$0xf]  ;;  %v746_v5 = vmov 0  }
  0x46   : > { %v272_v3 = vld [vmem:[#allocation7] sm:$0xf]  ;;  %499 = vmatpush.msk.msra.mxu0 %vm279_vm0, %v271_v1  ;;  %v359_v4 = vld [vmem:[%s948_s3] sm:$0xf]  ;;  %575 = vset.pattern.permute.xlu0 %v746_v5  ;;  %v330_v6 = vld [vmem:[#allocation7 + $0x8] sm:$0xf] }
  0x47   : > { %502 = vmatmul.msk.f32.vlgmr.msra.gmra.mxu1 %vm275_vm1, %v272_v3  ;;  %500 = vmatmul.msk.f32.vlgmr.msra.gmra.mxu0 %vm275_vm1, %v274_v2  ;;  %s506_s28 = sshll.u32 %s796_s22, 2  ;;  %s269_s20 = scalar_lea.vmem [#allocation8], %s890_s21  ;;  %vm366_vm2 = vcmask 60416  }
  0x48   : > { %s379_s7 = scalar_lea.hbm %s949_s4, %s506_s28  ;;  %s381_s14 = sshll.u32 %s269_s20, 4  ;;  %s382_s14 = int_to_ptr.vmem [resolvable:$true] %s381_s14 }
  0x49   : > { %s383_s19 = sshll.u32 %s379_s7, 4  ;;  %s369_s24 = scalar_lea.sflag [#allocation4], %s887_s12  ;;  %s384_s19 = int_to_ptr.hbm [resolvable:$true] %s383_s19 }
  0x4a   : > { %s680_s27 = sshra.s32 %s384_s19, 4  ;;  %s686_s21 = scalar_lea.hbm %s949_s4, 8  ;;  %s681_s27 = int_to_ptr.hbm [resolvable:$true] %s680_s27 }
  0x4b   : > { %s682_s22 = scalar_lea.hbm %s681_s27, 4  ;;  %p687_p7 = scmp.lt.s32.totalorder %s681_s27, %s949_s4 }
  0x4c   : > { %p683_p1 = scmp.ne.s32.totalorder %s681_s27, %s682_s22  ;;  %p688_p9 = scmp.lt.s32.totalorder %s686_s21, %s682_s22 }
  0x4d   : > { %362 = vperm.xlu0 %575, %v359_v4  }
  0x4e   : > { %p684_p3 = pnand %p683_p1, %p836_p0  ;;  %p689_p8 = por %p688_p9, %p687_p7 }
  0x50   : > { %p685_p13 = pneg %p684_p3 }
  0x52   : > { %p690_p10 = pnand %p689_p8, %p685_p13 }
  0xb7   : > { %v332_v7 = vpop.permute.xlu0 %331 }
  0xb8   : > { %503 = vmatpush.msk.msra.mxu2 %vm279_vm0, %v332_v7 }
  0xb9   : > { %504 = vmatmul.msk.f32.vlgmr.msra.gmra.mxu2 %vm275_vm1, %v330_v6 }
  0xbf   : > { %v363_v12 = vpop.permute.xlu0 %362 }
  0xc4   : > { %v300_v8 = vpop.f32.mrf.mxu0  ;;  %v326_v9 = vpop.f32.mrf.mxu1 }
  0xc5   : > { %v327_v10 = vadd.f32 %v326_v9, %v300_v8 }
 0x13c   : > { %v355_v11 = vpop.f32.mrf.mxu2 }
 0x13d   : > { %v358_v13 = vadd.f32 %v355_v11, %v327_v10 }
 0x13f   : > { %v365_v14 = vadd.f32 %v363_v12, %v358_v13 }
 0x141   : > { %367 = vst.msk [vmem:[%s269_s20] sm:$0xf] %vm366_vm2, %v365_v14 }
 0x142   : > { %693 = shalt.err (!%p690_p10)
}
 0x143   : > { %517 = dma.vmem_to_hbm [thread:$0]  (%p836_p0), %s382_s14, 64, %s384_s19, %s369_s24  }
 0x144 PF: > { %s395_s12 = sand.u32 1, %s728_s15   ;;  %p961_p12 = scmp.ge.s32.totalorder %s740_s18, 2 }
 0x145   : > { %s396_s23 = scalar_lea.sflag [#allocation4], %s395_s12 }
 0x146   : > { %p531_p5 = pnand %p961_p12, %p842_p6 }
 0x148   : > { %p532_p11 = pneg %p531_p5 }
 0x14a   : > { %723 = dma.done.wait (%p532_p11), %s396_s23, 64  }
 0x14b   : > { %725 = vsyncadd (%p532_p11), %s396_s23, 4294967232  ;;  %s962_s6 = sld [smem:[#allocation13_spill]]  ;;  %p20_p2 = scmp.ge.s32.totalorder %s812_s29, 4  }
 0x14c   : > { %s963_s17 = sld [smem:[#allocation14_spill]]  ;;  %s964_s15 = smov %s732_s16 }
 0x14d   : > { %s966_s18 = smov %s812_s29  ;;  %22 = sbr.rel (!%p20_p2) target bundleno = 9 (0x9), region = 100 }
 0x151   : > { %s965_s16 = smov %s962_s6 }
 0x152   :  { %402 = vsyncpa [#allocation3], 1 }
 0x153   :  { %404 = vsyncpa [#allocation3 + $0x1], 1 }
 0x154   :  { %405 = vsyncpa [#allocation6], 1 }
 0x155   :  { %407 = vsyncpa [#allocation6 + $0x1], 1 }
 0x156   :  { %408 = vsyncpa [#allocation4], 1 }
 0x157   :  { %410 = vsyncpa [#allocation4 + $0x1], 1 }

</bundles_post_ra>
